<compile_context>
chip_gen: v6e
topology: v6e:2x2x1
jax: 0.10.0
libtpu: 0.0.40
codegen_flags: <defaults>
</compile_context>

<pallas_src>
import jax
import jax.numpy as jnp
from jax.experimental import pallas as pl
from jax.experimental.pallas import tpu as pltpu

# ---- model hyper-params (synthetic, matching the module's __init__ shapes) ----
X_DIM = 16          # opt['x_dim']
HIDDEN = 32         # FeedFowardNet hidden width
LAYER_NUM = 2       # opt['layer_num']  (two hidden layers)
BATCH = 256         # demo batch

VMEM_BUDGET_BYTES = 12 << 20   # conservative: fits v5e (16 MiB scoped default),
                               # ample headroom on v6e/v7x
TILE_B_CEIL = 8192             # lane-tile ceiling (batch columns per grid step)


def denoiser_kernel(xt_ref, w0t_ref, b0t_ref, w1t_ref, b1t_ref, w2t_ref,
                    b2t_ref, out_ref):
    """Transposed MLP forward for one batch tile.

    Shapes (batch on the lane axis):
      xt:  (X_DIM, TB)      w0t: (HIDDEN, X_DIM)   b0t: (HIDDEN, 1)
      h:   (HIDDEN, TB)     w1t: (HIDDEN, HIDDEN)  b1t: (HIDDEN, 1)
      out: (2*X_DIM, TB)    w2t: (2*X_DIM, HIDDEN) b2t: (2*X_DIM, 1)
    Output rows [0, X_DIM) = mu, rows [X_DIM, 2*X_DIM) = exp(log_sigma).
    """
    xt = xt_ref[...]                                              # (X_DIM, TB)

    h = jnp.dot(w0t_ref[...], xt, preferred_element_type=jnp.float32)
    h = jnp.tanh(h + b0t_ref[...])                                # (HIDDEN, TB)

    h = jnp.dot(w1t_ref[...], h, preferred_element_type=jnp.float32)
    h = jnp.tanh(h + b1t_ref[...])                                # (HIDDEN, TB)

    out = jnp.dot(w2t_ref[...], h, preferred_element_type=jnp.float32)
    out = out + b2t_ref[...]                                      # (2*X_DIM, TB)

    # mu rows pass through; sigma rows get exp().  X_DIM=16 is sublane-aligned,
    # so both are clean sublane-row slices - no lane masking anywhere.
    out_ref[:X_DIM, :] = out[:X_DIM, :]
    out_ref[X_DIM:, :] = jnp.exp(out[X_DIM:, :])


def _pick_tile_b(B):
    """Lane-tile (batch columns per grid step), chosen by VMEM budget."""
    # f32 bytes per batch column resident in VMEM: double-buffered x (X_DIM)
    # and fused-out (2*X_DIM) tiles, plus in-body activations (2*HIDDEN) and
    # the pre-activation output (2*X_DIM).
    per_col = 4 * (2 * X_DIM + 2 * (2 * X_DIM) + 2 * HIDDEN + 2 * X_DIM)
    cap = VMEM_BUDGET_BYTES // per_col
    cap = max(128, min(TILE_B_CEIL, (cap // 128) * 128))
    if B <= cap:
        return B                      # single grid step: zero per-step overhead
    # Largest 128-multiple divisor of B under the cap (keeps lanes unmasked).
    tile = cap
    while tile >= 128 and B % tile:
        tile -= 128
    return tile if tile >= 128 else B  # ragged B fallback: single step


def denoiser_forward(noisy_x, params, tile_b=None):
    """Wrapper: returns (mu, sigma), each (B, X_DIM) float32."""
    w0, b0, w1, b1, w2, b2 = params
    B = noisy_x.shape[0]
    if tile_b is None:
        tile_b = _pick_tile_b(B)
    assert B % tile_b == 0
    num_steps = B // tile_b

    # Layout plumbing done once in XLA (HBM-side, cheap): batch onto lanes.
    xt = noisy_x.T                                    # (X_DIM, B)
    w0t, w1t, w2t = w0.T, w1.T, w2.T                  # (H,X), (H,H), (2X,H)
    b0t = b0.reshape(-1, 1)                           # (H, 1)
    b1t = b1.reshape(-1, 1)                           # (H, 1)
    b2t = b2.reshape(-1, 1)                           # (2X, 1)

    const_map = lambda i: (0, 0)                      # resident across steps
    full = lambda a: pl.BlockSpec(a.shape, const_map)

    # Only ask for a megacore split when each core gets a substantial tile;
    # for small batches a single serial step is cheaper on every generation.
    semantics = ("parallel",) if (num_steps >= 2 and tile_b >= 1024) \
        else ("arbitrary",)

    fused_t = pl.pallas_call(
        denoiser_kernel,
        out_shape=jax.ShapeDtypeStruct((2 * X_DIM, B), jnp.float32),
        grid_spec=pl.GridSpec(
            grid=(num_steps,),
            in_specs=[
                pl.BlockSpec((X_DIM, tile_b), lambda i: (0, i)),     # x^T
                full(w0t), full(b0t),
                full(w1t), full(b1t),
                full(w2t), full(b2t),
            ],
            out_specs=pl.BlockSpec((2 * X_DIM, tile_b), lambda i: (0, i)),
        ),
        compiler_params=pltpu.CompilerParams(dimension_semantics=semantics),
    )(xt, w0t, b0t, w1t, b1t, w2t, b2t)

    # Free XLA slices/transposes outside the kernel -> module-facing layout.
    mu = fused_t[:X_DIM, :].T                          # (B, X_DIM)
    sigma = fused_t[X_DIM:, :].T                       # (B, X_DIM)
    return mu, sigma


def init_params(key):
    """Deterministic synthetic weights (shapes match FeedFowardNet)."""
    k0, k1, k2 = jax.random.split(key, 3)
    scale0 = 1.0 / jnp.sqrt(X_DIM)
    scaleh = 1.0 / jnp.sqrt(HIDDEN)
    w0 = jax.random.normal(k0, (X_DIM, HIDDEN), jnp.float32) * scale0
    b0 = jnp.zeros((1, HIDDEN), jnp.float32)
    w1 = jax.random.normal(k1, (HIDDEN, HIDDEN), jnp.float32) * scaleh
    b1 = jnp.zeros((1, HIDDEN), jnp.float32)
    w2 = jax.random.normal(k2, (HIDDEN, 2 * X_DIM), jnp.float32) * scaleh
    b2 = jnp.zeros((1, 2 * X_DIM), jnp.float32)
    return (w0, b0, w1, b1, w2, b2)


def reference_forward(noisy_x, params):
    """Pure-JAX reference mirroring the PyTorch forward."""
    w0, b0, w1, b1, w2, b2 = params
    h = jnp.tanh(noisy_x @ w0 + b0)
    h = jnp.tanh(h @ w1 + b1)
    out = h @ w2 + b2
    mu, log_sigma = out[:, :X_DIM], out[:, X_DIM:]
    return mu, jnp.exp(log_sigma)


if __name__ == "__main__":
    key = jax.random.PRNGKey(0)
    kp, kx = jax.random.split(key)
    params = init_params(kp)
    noisy_x = jax.random.normal(kx, (BATCH, X_DIM), jnp.float32)

    mu_ref, sigma_ref = reference_forward(noisy_x, params)

    # Main path: auto tile (single grid step for this batch).
    mu, sigma = denoiser_forward(noisy_x, params)
    jax.block_until_ready((mu, sigma))
    assert jnp.allclose(mu, mu_ref, atol=1e-5, rtol=1e-5), "mu mismatch"
    assert jnp.allclose(sigma, sigma_ref, atol=1e-5, rtol=1e-5), "sigma mismatch"

    # Also exercise the multi-step grid path (2 tiles of 128 lanes).
    mu2, sigma2 = denoiser_forward(noisy_x, params, tile_b=128)
    jax.block_until_ready((mu2, sigma2))
    assert jnp.allclose(mu2, mu_ref, atol=1e-5, rtol=1e-5), "mu mismatch (tiled)"
    assert jnp.allclose(sigma2, sigma_ref, atol=1e-5, rtol=1e-5), "sigma mismatch (tiled)"

    print("KERNEL_OK")
</pallas_src>

<mosaic_0001>
module attributes {stable_mosaic.version = 11 : i64} {
  func.func @denoiser_kernel(%arg0: i32, %arg1: memref<16x256xf32, #tpu.memory_space<vmem>>, %arg2: memref<32x16xf32, #tpu.memory_space<vmem>>, %arg3: memref<32x1xf32, #tpu.memory_space<vmem>>, %arg4: memref<32x32xf32, #tpu.memory_space<vmem>>, %arg5: memref<32x1xf32, #tpu.memory_space<vmem>>, %arg6: memref<32x32xf32, #tpu.memory_space<vmem>>, %arg7: memref<32x1xf32, #tpu.memory_space<vmem>>, %arg8: memref<32x256xf32, #tpu.memory_space<vmem>>) attributes {dimension_semantics = [#tpu.dimension_semantics<arbitrary>], iteration_bounds = array<i64: 1>, scalar_prefetch = 0 : i64, scratch_operands = 0 : i64, tpu.core_type = #tpu.core_type<tc>, window_params = [{transform_indices = @transform_0, window_bounds = array<i64: 16, 256>}, {pipeline_mode = #tpu.pipeline_mode<synchronous>, transform_indices = @transform_1, window_bounds = array<i64: 32, 16>}, {pipeline_mode = #tpu.pipeline_mode<synchronous>, transform_indices = @transform_2, window_bounds = array<i64: 32, 1>}, {pipeline_mode = #tpu.pipeline_mode<synchronous>, transform_indices = @transform_3, window_bounds = array<i64: 32, 32>}, {pipeline_mode = #tpu.pipeline_mode<synchronous>, transform_indices = @transform_4, window_bounds = array<i64: 32, 1>}, {pipeline_mode = #tpu.pipeline_mode<synchronous>, transform_indices = @transform_5, window_bounds = array<i64: 32, 32>}, {pipeline_mode = #tpu.pipeline_mode<synchronous>, transform_indices = @transform_6, window_bounds = array<i64: 32, 1>}, {transform_indices = @transform_7, window_bounds = array<i64: 32, 256>}]} {
    %c0 = arith.constant 0 : index
    %c0_0 = arith.constant 0 : index
    %0 = vector.load %arg1[%c0, %c0_0] : memref<16x256xf32, #tpu.memory_space<vmem>>, vector<16x256xf32>
    %c0_1 = arith.constant 0 : index
    %c0_2 = arith.constant 0 : index
    %1 = vector.load %arg2[%c0_1, %c0_2] : memref<32x16xf32, #tpu.memory_space<vmem>>, vector<32x16xf32>
    %cst = arith.constant dense<0.000000e+00> : vector<32x256xf32>
    %2 = tpu.matmul %1, %0, %cst {dimension_numbers = #tpu.dot_dimension_numbers<[1], [0], [0], [1], [0, 0, 1, 1], [], []>} : vector<32x16xf32>, vector<16x256xf32>, vector<32x256xf32> -> vector<32x256xf32>
    %c0_3 = arith.constant 0 : index
    %c0_4 = arith.constant 0 : index
    %3 = vector.load %arg3[%c0_3, %c0_4] : memref<32x1xf32, #tpu.memory_space<vmem>>, vector<32x1xf32>
    %4 = vector.broadcast %3 : vector<32x1xf32> to vector<32x256xf32>
    %5 = arith.addf %2, %4 : vector<32x256xf32>
    %6 = math.tanh %5 : vector<32x256xf32>
    %c0_5 = arith.constant 0 : index
    %c0_6 = arith.constant 0 : index
    %7 = vector.load %arg4[%c0_5, %c0_6] : memref<32x32xf32, #tpu.memory_space<vmem>>, vector<32x32xf32>
    %cst_7 = arith.constant dense<0.000000e+00> : vector<32x256xf32>
    %8 = tpu.matmul %7, %6, %cst_7 {dimension_numbers = #tpu.dot_dimension_numbers<[1], [0], [0], [1], [0, 0, 1, 1], [], []>} : vector<32x32xf32>, vector<32x256xf32>, vector<32x256xf32> -> vector<32x256xf32>
    %c0_8 = arith.constant 0 : index
    %c0_9 = arith.constant 0 : index
    %9 = vector.load %arg5[%c0_8, %c0_9] : memref<32x1xf32, #tpu.memory_space<vmem>>, vector<32x1xf32>
    %10 = vector.broadcast %9 : vector<32x1xf32> to vector<32x256xf32>
    %11 = arith.addf %8, %10 : vector<32x256xf32>
    %12 = math.tanh %11 : vector<32x256xf32>
    %c0_10 = arith.constant 0 : index
    %c0_11 = arith.constant 0 : index
    %13 = vector.load %arg6[%c0_10, %c0_11] : memref<32x32xf32, #tpu.memory_space<vmem>>, vector<32x32xf32>
    %cst_12 = arith.constant dense<0.000000e+00> : vector<32x256xf32>
    %14 = tpu.matmul %13, %12, %cst_12 {dimension_numbers = #tpu.dot_dimension_numbers<[1], [0], [0], [1], [0, 0, 1, 1], [], []>} : vector<32x32xf32>, vector<32x256xf32>, vector<32x256xf32> -> vector<32x256xf32>
    %c0_13 = arith.constant 0 : index
    %c0_14 = arith.constant 0 : index
    %15 = vector.load %arg7[%c0_13, %c0_14] : memref<32x1xf32, #tpu.memory_space<vmem>>, vector<32x1xf32>
    %16 = vector.broadcast %15 : vector<32x1xf32> to vector<32x256xf32>
    %17 = arith.addf %14, %16 : vector<32x256xf32>
    %18 = vector.extract_strided_slice %17 {offsets = [0, 0], sizes = [16, 256], strides = [1, 1]} : vector<32x256xf32> to vector<16x256xf32>
    %c0_15 = arith.constant 0 : index
    %c0_16 = arith.constant 0 : index
    %19 = vector.load %arg8[%c0_15, %c0_16] : memref<32x256xf32, #tpu.memory_space<vmem>>, vector<16x256xf32>
    tpu.vector_store %arg8[%c0_15, %c0_16], %18 {strides = array<i32>} : memref<32x256xf32, #tpu.memory_space<vmem>>, vector<16x256xf32>,
    %20 = vector.extract_strided_slice %17 {offsets = [16, 0], sizes = [16, 256], strides = [1, 1]} : vector<32x256xf32> to vector<16x256xf32>
    %21 = math.exp %20 : vector<16x256xf32>
    %c16 = arith.constant 16 : index
    %c0_17 = arith.constant 0 : index
    %22 = vector.load %arg8[%c16, %c0_17] : memref<32x256xf32, #tpu.memory_space<vmem>>, vector<16x256xf32>
    tpu.vector_store %arg8[%c16, %c0_17], %21 {strides = array<i32>} : memref<32x256xf32, #tpu.memory_space<vmem>>, vector<16x256xf32>,
    return
  }
  func.func @transform_0(%arg0: i32) -> (i32, i32) {
    %c0_i32 = arith.constant 0 : i32
    %c0_i32_0 = arith.constant 0 : i32
    return %c0_i32, %arg0 : i32, i32
  }
  func.func @transform_1(%arg0: i32) -> (i32, i32) {
    %c0_i32 = arith.constant 0 : i32
    %c0_i32_0 = arith.constant 0 : i32
    %c0_i32_1 = arith.constant 0 : i32
    return %c0_i32, %c0_i32_0 : i32, i32
  }
  func.func @transform_2(%arg0: i32) -> (i32, i32) {
    %c0_i32 = arith.constant 0 : i32
    %c0_i32_0 = arith.constant 0 : i32
    %c0_i32_1 = arith.constant 0 : i32
    return %c0_i32, %c0_i32_0 : i32, i32
  }
  func.func @transform_3(%arg0: i32) -> (i32, i32) {
    %c0_i32 = arith.constant 0 : i32
    %c0_i32_0 = arith.constant 0 : i32
    %c0_i32_1 = arith.constant 0 : i32
    return %c0_i32, %c0_i32_0 : i32, i32
  }
  func.func @transform_4(%arg0: i32) -> (i32, i32) {
    %c0_i32 = arith.constant 0 : i32
    %c0_i32_0 = arith.constant 0 : i32
    %c0_i32_1 = arith.constant 0 : i32
    return %c0_i32, %c0_i32_0 : i32, i32
  }
  func.func @transform_5(%arg0: i32) -> (i32, i32) {
    %c0_i32 = arith.constant 0 : i32
    %c0_i32_0 = arith.constant 0 : i32
    %c0_i32_1 = arith.constant 0 : i32
    return %c0_i32, %c0_i32_0 : i32, i32
  }
  func.func @transform_6(%arg0: i32) -> (i32, i32) {
    %c0_i32 = arith.constant 0 : i32
    %c0_i32_0 = arith.constant 0 : i32
    %c0_i32_1 = arith.constant 0 : i32
    return %c0_i32, %c0_i32_0 : i32, i32
  }
  func.func @transform_7(%arg0: i32) -> (i32, i32) {
    %c0_i32 = arith.constant 0 : i32
    %c0_i32_0 = arith.constant 0 : i32
    return %c0_i32, %arg0 : i32, i32
  }
}

</mosaic_0001>

<bundles_post_ra>
// kernel: tpu_custom_call.1
= control target key start
LH: loop header
LB: loop body
LE: loop exit
PB: predicated region body
PF: predicated region fallthrough
CT: control target
= control target key end

     0   :  { %vm59_vm0 = vcmask 130048   ;;  %v553_v5 = vmov 0.0   ;;  %s709_s0 = inlined_call_operand.vmem [shape: f32[16,256], index: 0, kind: input, shape index: {}]   ;;  %s710_s1 = inlined_call_operand.vmem [shape: f32[32,16], index: 1, kind: input, shape index: {}]   ;;  %s711_s2 = inlined_call_operand.vmem [shape: f32[32,1], index: 2, kind: input, shape index: {}]   ;;  %s712_s3 = inlined_call_operand.vmem [shape: f32[32,32], index: 3, kind: input, shape index: {}]   ;;  %s713_s4 = inlined_call_operand.vmem [shape: f32[32,1], index: 4, kind: input, shape index: {}]   ;;  %s714_s5 = inlined_call_operand.vmem [shape: f32[32,32], index: 5, kind: input, shape index: {}]   ;;  %s715_s6 = inlined_call_operand.vmem [shape: f32[32,1], index: 6, kind: input, shape index: {}]   ;;  %s716_s7 = inlined_call_operand.hbm [shape: f32[32,256], index: 7, kind: output, shape index: {}]  }
   0x1   :  { %v30_v0 = vld [vmem:[%s709_s0 + $0x18] sm:$0xff]  ;;  %v29_v1 = vld [vmem:[%s709_s0 + $0x10] sm:$0xff]  ;;  %v28_v2 = vld [vmem:[%s709_s0 + $0x8] sm:$0xff]  ;;  %148 = vmatprep.mubr.f32.mxu1 %v553_v5  ;;  %136 = vmatprep.mubr.f32.mxu0 %v553_v5 }
   0x2   :  { %480 = vmatprep.subr.mxu1 %v30_v0  ;;  %100 = vmatprep.subr.mxu0 %v30_v0  ;;  %v27_v3 = vld [vmem:[%s709_s0] sm:$0xff]  ;;  %v33_v4 = vld [vmem:[%s710_s1 + $0x10] sm:$0xff]  ;;  %v38_v7 = vld [vmem:[%s711_s2 + $0x18] sm:$0xff] }
   0x3   :  { %482 = vmatpush1.msra.mxu1 %v29_v1  ;;  %101 = vmatpush1.msra.mxu0 %v29_v1  ;;  %v31_v6 = vld [vmem:[%s710_s1] sm:$0xff]  ;;  %v34_v8 = vld [vmem:[%s710_s1 + $0x18] sm:$0xff] }
   0x4   :  { %481 = vmatprep.subr.mxu1 %v28_v2  ;;  %102 = vmatprep.subr.mxu0 %v28_v2 }
   0x5   :  { %483 = vmatpush1.msra.mxu1 %v27_v3  ;;  %103 = vmatpush1.msra.mxu0 %v27_v3 }
   0x6   :  { %470 = vmatmul.mubr.msk.f32.vlgmr.msra.gmra.mxu1 %vm59_vm0, %v33_v4 }
   0x7   :  { %154 = vmatprep.mubr.f32.mxu1 %v553_v5 }
   0x8   :  { %12 = vsyncpa [#allocation3], 0  ;;  %468 = vmatmul.mubr.msk.f32.vlgmr.msra.gmra.mxu0 %vm59_vm0, %v31_v6  ;;  %v554_v9 = vmov 0   ;;  %v36_v10 = vld [vmem:[%s711_s2 + $0x8] sm:$0xff]  ;;  %v37_v12 = vld [vmem:[%s711_s2 + $0x10] sm:$0xff]  ;;  %vm197_vm1 = vcmask 261120  }
   0x9   :  { %489 = vset.pattern.permute.xlu0 %v554_v9  ;;  %142 = vmatprep.mubr.f32.mxu0 %v553_v5  ;;  %v32_v11 = vld [vmem:[%s710_s1 + $0x8] sm:$0xff]  ;;  %v35_v13 = vld [vmem:[%s711_s2] sm:$0xff]  ;;  %v176_v14 = vld [vmem:[%s713_s4 + $0x18] sm:$0xff] }
   0xa   :  { %56 = vperm.xlu0 %489, %v38_v7   ;;  %471 = vmatmul.mubr.msk.f32.gmra.mxu1 %vm59_vm0, %v34_v8  ;;  %v175_v15 = vld [vmem:[%s713_s4 + $0x10] sm:$0xff]  ;;  %v174_v16 = vld [vmem:[%s713_s4 + $0x8] sm:$0xff]  ;;  %v173_v17 = vld [vmem:[%s713_s4] sm:$0xff] }
   0xb   :  { %490 = vset.pattern.permute.xlu1 %v554_v9  ;;  %274 = vmatprep.mubr.f32.mxu1 %v553_v5  ;;  %v313_v18 = vld [vmem:[%s715_s6 + $0x10] sm:$0xff]  ;;  %v314_v19 = vld [vmem:[%s715_s6 + $0x18] sm:$0xff]  ;;  %v311_v20 = vld [vmem:[%s715_s6] sm:$0xff] }
   0xc   :  { %46 = vperm.xlu1 %490, %v36_v10   ;;  %469 = vmatmul.mubr.msk.f32.gmra.mxu0 %vm59_vm0, %v32_v11  ;;  %v312_v21 = vld [vmem:[%s715_s6 + $0x8] sm:$0xff]  ;;  %v169_v49 = vld [vmem:[%s712_s3] sm:$0xff]  ;;  %v171_v52 = vld [vmem:[%s712_s3 + $0x10] sm:$0xff] }
   0xd   :  { %411 = vmatprep.mubr.f32.mxu0 %v553_v5  ;;  %v170_v51 = vld [vmem:[%s712_s3 + $0x8] sm:$0xff]  ;;  %v172_v53 = vld [vmem:[%s712_s3 + $0x18] sm:$0xff] }
   0xe   :  { %51 = vperm.xlu0 %489, %v37_v12  }
  0x10   :  { %41 = vperm.xlu1 %490, %v35_v13  }
  0x12   :  { %194 = vperm.xlu0 %489, %v176_v14  }
  0x14   :  { %189 = vperm.xlu1 %490, %v175_v15  }
  0x16   :  { %184 = vperm.xlu0 %489, %v174_v16  }
  0x18   :  { %179 = vperm.xlu1 %490, %v173_v17  }
  0x1a   :  { %327 = vperm.xlu0 %489, %v313_v18   ;;  %v307_v18 = vld [vmem:[%s714_s5] sm:$0xff] }
  0x1c   :  { %332 = vperm.xlu1 %490, %v314_v19  }
  0x1e   :  { %317 = vperm.xlu0 %489, %v311_v20   ;;  %v308_v20 = vld [vmem:[%s714_s5 + $0x8] sm:$0xff] }
  0x20   :  { %322 = vperm.xlu1 %490, %v312_v21   ;;  %v309_v21 = vld [vmem:[%s714_s5 + $0x10] sm:$0xff] }
  0x85   :  { %v57_v23 = vpop.permute.xlu0 %56 }
  0x87   :  { %v47_v28 = vpop.permute.xlu1 %46 }
  0x89   :  { %v52_v31 = vpop.permute.xlu0 %51 }
  0x8b   :  { %v42_v38 = vpop.permute.xlu1 %41 }
  0x8d   :  { %v195_v59 = vpop.permute.xlu0 %194 }
  0x8f   :  { %v190_v61 = vpop.permute.xlu1 %189 }
  0x91   :  { %v185_v3 = vpop.permute.xlu0 %184 }
  0x93   :  { %v180_v7 = vpop.permute.xlu1 %179 }
  0xc6   :  { %v150_v22 = vpop.f32.mrf.mxu1 }
  0xc7   :  { %v151_v36 = vadd.f32 %v150_v22, %v52_v31  ;;  %v310_v22 = vld [vmem:[%s714_s5 + $0x18] sm:$0xff]  ;;  %s555_s5 = smov [#allocation2]  }
  0xc8   :  { %v138_v24 = vpop.f32.mrf.mxu0  ;;  %v152_v25 = vpop.f32.mrf.mxu1  ;;  %s457_s26 = sshll.u32 %s555_s5, 4  ;;  %s458_s26 = int_to_ptr.vmem [resolvable:$true] %s457_s26 }
  0xc9   :  { %v153_v34 = vadd.f32 %v152_v25, %v52_v31  ;;  %v139_v41 = vadd.f32 %v138_v24, %v42_v38  ;;  %v333_v24 = vpop.permute.xlu1 %332  ;;  %s531_s27 = scalar_lea.vmem %s458_s26, 1024  ;;  %p536_p1 = scmp.lt.s32.totalorder %s458_s26, %s458_s26 }
  0xca   :  { %v140_v26 = vpop.f32.mrf.mxu0  ;;  %v156_v27 = vpop.f32.mrf.mxu1  ;;  %p532_p0 = scmp.ne.s32.totalorder %s458_s26, %s531_s27  ;;  %p537_p2 = scmp.lt.s32.totalorder %s531_s27, %s531_s27 }
  0xcb   :  { %v157_v32 = vadd.f32 %v156_v27, %v57_v23  ;;  %v141_v40 = vadd.f32 %v140_v26, %v42_v38 }
  0xcc   :  { %v144_v29 = vpop.f32.mrf.mxu0  ;;  %v158_v30 = vpop.f32.mrf.mxu1  ;;  %p538_p3 = por %p537_p2, %p536_p1 }
  0xcd   :  { %v159_v33 = vadd.f32 %v158_v30, %v57_v23  ;;  %v145_v39 = vadd.f32 %v144_v29, %v47_v28  ;;  %v328_v23 = vpop.permute.xlu0 %327  ;;  %v323_v30 = vpop.permute.xlu1 %322 }
  0xce   :  { %v146_v35 = vpop.f32.mrf.mxu0  ;;  %p539_p4 = pnand %p538_p3, %p532_p0 }
  0xcf   :  { %491 = vtanh.f32 %v159_v33  ;;  %v147_v37 = vadd.f32 %v146_v35, %v47_v28 }
  0xd0   :  { %493 = vtanh.f32 %v157_v32 }
  0xd1   :  { %495 = vtanh.f32 %v153_v34  ;;  %v318_v25 = vpop.permute.xlu0 %317 }
  0xd2   :  { %497 = vtanh.f32 %v151_v36 }
  0xd3   :  { %499 = vtanh.f32 %v147_v37 }
  0xd4   :  { %501 = vtanh.f32 %v145_v39 }
  0xd5   :  { %503 = vtanh.f32 %v141_v40 }
  0xd6   :  { %505 = vtanh.f32 %v139_v41 }
  0xdc   :  { %v492_v42 = vpop.eup %491 }
  0xdd   :  { %v494_v43 = vpop.eup %493  ;;  %234 = vmatprep.subr.mxu1 %v492_v42 }
  0xde   :  { %v496_v44 = vpop.eup %495  ;;  %235 = vmatpush1.msra.mxu1 %v494_v43 }
  0xdf   :  { %v498_v45 = vpop.eup %497  ;;  %236 = vmatprep.subr.mxu1 %v496_v44 }
  0xe0   :  { %v500_v46 = vpop.eup %499  ;;  %237 = vmatpush1.msra.mxu1 %v498_v45 }
  0xe1   :  { %v502_v47 = vpop.eup %501  ;;  %238 = vmatprep.subr.mxu1 %v500_v46 }
  0xe2   :  { %v504_v48 = vpop.eup %503  ;;  %239 = vmatpush1.msra.mxu1 %v502_v47 }
  0xe3   :  { %v506_v50 = vpop.eup %505  ;;  %240 = vmatprep.subr.mxu1 %v504_v48 }
  0xe4   :  { %241 = vmatpush1.msra.mxu1 %v506_v50 }
  0xe5   :  { %472 = vmatmul.mubr.msk.f32.vlgmr.msra.gmra.mxu1 %vm197_vm1, %v169_v49 }
  0xe6   :  { %280 = vmatprep.mubr.f32.mxu1 %v553_v5 }
  0xe9   :  { %473 = vmatmul.mubr.msk.f32.gmra.mxu1 %vm197_vm1, %v170_v51 }
  0xea   :  { %286 = vmatprep.mubr.f32.mxu1 %v553_v5 }
  0xed   :  { %474 = vmatmul.mubr.msk.f32.gmra.mxu1 %vm197_vm1, %v171_v52 }
  0xee   :  { %292 = vmatprep.mubr.f32.mxu1 %v553_v5 }
  0xf1   :  { %475 = vmatmul.mubr.msk.f32.gmra.mxu1 %vm197_vm1, %v172_v53 }
 0x1a5   :  { %v276_v54 = vpop.f32.mrf.mxu1 }
 0x1a6   :  { %v277_v10 = vadd.f32 %v276_v54, %v180_v7 }
 0x1a7   :  { %v278_v55 = vpop.f32.mrf.mxu1 }
 0x1a8   :  { %v279_v9 = vadd.f32 %v278_v55, %v180_v7 }
 0x1a9   :  { %v282_v56 = vpop.f32.mrf.mxu1 }
 0x1aa   :  { %v283_v8 = vadd.f32 %v282_v56, %v185_v3 }
 0x1ab   :  { %v284_v57 = vpop.f32.mrf.mxu1 }
 0x1ac   :  { %v285_v6 = vadd.f32 %v284_v57, %v185_v3 }
 0x1ad   :  { %v288_v58 = vpop.f32.mrf.mxu1 }
 0x1ae   :  { %v289_v4 = vadd.f32 %v288_v58, %v190_v61 }
 0x1af   :  { %v290_v60 = vpop.f32.mrf.mxu1 }
 0x1b0   :  { %v291_v1 = vadd.f32 %v290_v60, %v190_v61 }
 0x1b1   :  { %v294_v62 = vpop.f32.mrf.mxu1 }
 0x1b2   :  { %v295_v63 = vadd.f32 %v294_v62, %v195_v59 }
 0x1b3   :  { %v296_v0 = vpop.f32.mrf.mxu1 }
 0x1b4   :  { %v297_v2 = vadd.f32 %v296_v0, %v195_v59 }
 0x1b6   :  { %507 = vtanh.f32 %v297_v2 }
 0x1b7   :  { %509 = vtanh.f32 %v295_v63 }
 0x1b8   :  { %511 = vtanh.f32 %v291_v1 }
 0x1b9   :  { %513 = vtanh.f32 %v289_v4 }
 0x1ba   :  { %515 = vtanh.f32 %v285_v6 }
 0x1bb   :  { %517 = vtanh.f32 %v283_v8 }
 0x1bc   :  { %519 = vtanh.f32 %v279_v9 }
 0x1bd   :  { %521 = vtanh.f32 %v277_v10 }
 0x1c3   :  { %v508_v11 = vpop.eup %507 }
 0x1c4   :  { %v510_v12 = vpop.eup %509  ;;  %371 = vmatprep.subr.mxu0 %v508_v11 }
 0x1c5   :  { %v512_v13 = vpop.eup %511  ;;  %372 = vmatpush1.msra.mxu0 %v510_v12 }
 0x1c6   :  { %v514_v14 = vpop.eup %513  ;;  %373 = vmatprep.subr.mxu0 %v512_v13 }
 0x1c7   :  { %v516_v15 = vpop.eup %515  ;;  %374 = vmatpush1.msra.mxu0 %v514_v14 }
 0x1c8   :  { %v518_v16 = vpop.eup %517  ;;  %375 = vmatprep.subr.mxu0 %v516_v15 }
 0x1c9   :  { %v520_v17 = vpop.eup %519  ;;  %376 = vmatpush1.msra.mxu0 %v518_v16 }
 0x1ca   :  { %v522_v19 = vpop.eup %521  ;;  %377 = vmatprep.subr.mxu0 %v520_v17 }
 0x1cb   :  { %378 = vmatpush1.msra.mxu0 %v522_v19 }
 0x1cc   :  { %476 = vmatmul.mubr.msk.f32.vlgmr.msra.gmra.mxu0 %vm197_vm1, %v307_v18 }
 0x1cd   :  { %417 = vmatprep.mubr.f32.mxu0 %v553_v5 }
 0x1d0   :  { %477 = vmatmul.mubr.msk.f32.gmra.mxu0 %vm197_vm1, %v308_v20 }
 0x1d1   :  { %423 = vmatprep.mubr.f32.mxu0 %v553_v5 }
 0x1d4   :  { %478 = vmatmul.mubr.msk.f32.gmra.mxu0 %vm197_vm1, %v309_v21 }
 0x1d5   :  { %429 = vmatprep.mubr.f32.mxu0 %v553_v5 }
 0x1d8   :  { %479 = vmatmul.mubr.msk.f32.gmra.mxu0 %vm197_vm1, %v310_v22 }
 0x28c   :  { %v413_v26 = vpop.f32.mrf.mxu0 }
 0x28d   :  { %v414_v27 = vadd.f32 %v413_v26, %v318_v25 }
 0x28e   :  { %v415_v28 = vpop.f32.mrf.mxu0 }
 0x28f   :  { %436 = vst [vmem:[#allocation2] sm:$0xff] %v414_v27  ;;  %v416_v29 = vadd.f32 %v415_v28, %v318_v25 }
 0x290   :  { %v419_v31 = vpop.f32.mrf.mxu0 }
 0x291   :  { %437 = vst [vmem:[#allocation2 + $0x8] sm:$0xff] %v416_v29  ;;  %v420_v32 = vadd.f32 %v419_v31, %v323_v30 }
 0x292   :  { %v421_v33 = vpop.f32.mrf.mxu0 }
 0x293   :  { %438 = vst [vmem:[#allocation2 + $0x10] sm:$0xff] %v420_v32  ;;  %v422_v5 = vadd.f32 %v421_v33, %v323_v30 }
 0x294   :  { %v425_v34 = vpop.f32.mrf.mxu0 }
 0x295   :  { %439 = vst [vmem:[#allocation2 + $0x18] sm:$0xff] %v422_v5  ;;  %v426_v35 = vadd.f32 %v425_v34, %v328_v23 }
 0x296   :  { %v427_v36 = vpop.f32.mrf.mxu0 }
 0x297   :  { %v440_v37 = vmul.f32 1.442695, %v426_v35  ;;  %v428_v38 = vadd.f32 %v427_v36, %v328_v23 }
 0x298   :  { %v431_v39 = vpop.f32.mrf.mxu0 }
 0x299   :  { %523 = vpow2.f32 %v440_v37  ;;  %v442_v40 = vmul.f32 1.442695, %v428_v38  ;;  %v432_v41 = vadd.f32 %v431_v39, %v333_v24 }
 0x29a   :  { %v433_v42 = vpop.f32.mrf.mxu0 }
 0x29b   :  { %525 = vpow2.f32 %v442_v40  ;;  %v444_v43 = vmul.f32 1.442695, %v432_v41  ;;  %v434_v44 = vadd.f32 %v433_v42, %v333_v24 }
 0x29d   :  { %527 = vpow2.f32 %v444_v43  ;;  %v446_v45 = vmul.f32 1.442695, %v434_v44 }
 0x29f   :  { %529 = vpow2.f32 %v446_v45 }
 0x2a6   :  { %v524_v46 = vpop.eup %523 }
 0x2a7   :  { %448 = vst [vmem:[#allocation2 + $0x20] sm:$0xff] %v524_v46 }
 0x2a8   :  { %v526_v47 = vpop.eup %525 }
 0x2a9   :  { %449 = vst [vmem:[#allocation2 + $0x28] sm:$0xff] %v526_v47 }
 0x2aa   :  { %v528_v48 = vpop.eup %527 }
 0x2ab   :  { %450 = vst [vmem:[#allocation2 + $0x30] sm:$0xff] %v528_v48 }
 0x2ac   :  { %v530_v49 = vpop.eup %529 }
 0x2ad   :  { %451 = vst [vmem:[#allocation2 + $0x38] sm:$0xff] %v530_v49 }
 0x2ae   :  { %542 = shalt.err (!%p539_p4)
}
 0x2af   :  { %s556_s28 = smov 256   ;;  %s557_s29 = smov 16  }
 0x2b0   :  { %463 = dma.vmem_to_hbm [thread:$0]  %s458_s26, 1024, %s716_s7, [#allocation3], %s556_s28, %s556_s28, %s557_s29  }
 0x2b1   :  { %551 = dma.done.wait [#allocation3], 1024  }
 0x2b2   :  { %552 = vsyncadd [#allocation3], 4294966272 }
 0x2b3   :  { %467 = vsyncpa [#allocation3], 1 }

</bundles_post_ra>
